<compile_context>
chip_gen: v5e
topology: v5e:2x2
jax: 0.10.0
libtpu: 0.0.40
codegen_flags: <defaults>
</compile_context>

<pallas_src>
import jax
import jax.numpy as jnp
from jax.experimental import pallas as pl
from jax.experimental.pallas import tpu as pltpu

LANE = 128


def _round_up(x, m):
    return ((x + m - 1) // m) * m


def mlp_kernel(x_ref, w1_ref, b1_ref, w2_ref, b2_ref, w3_ref, b3_ref, o_ref):
    # Layer 1 + ReLU: bf16 MXU matmul, f32 accumulation, f32 elementwise.
    h1 = jnp.dot(x_ref[...], w1_ref[...], preferred_element_type=jnp.float32)
    h1 = jnp.maximum(h1 + b1_ref[...], 0.0)

    # Layer 2 + ReLU.
    h2 = jnp.dot(h1.astype(jnp.bfloat16), w2_ref[...],
                 preferred_element_type=jnp.float32)
    h2 = jnp.maximum(h2 + b2_ref[...], 0.0)

    # Layer 3 + Sigmoid (exp on EUP, approximate reciprocal on EUP).
    z = jnp.dot(h2.astype(jnp.bfloat16), w3_ref[...],
                preferred_element_type=jnp.float32)
    z = z + b3_ref[...]
    o_ref[...] = pl.reciprocal(1.0 + jnp.exp(-z), approx=True).astype(o_ref.dtype)


def simple_neural_network(x, w1, b1, w2, b2, w3, b3, *, block_m=512):
    """Forward pass. Weights are [in, out] (pre-transposed); biases are [out]."""
    batch, in_size = x.shape
    h1_size = w1.shape[1]
    h2_size = w2.shape[1]
    out_size = w3.shape[1]

    # ---- Host-side prep: lane-pad every feature dim to 128, cast matmul
    # operands to bf16, keep biases f32. Zero padding keeps semantics exact:
    # padded hidden columns stay 0 through ReLU and contribute nothing to the
    # next layer; padded output columns are sliced off at the end.
    in_p = _round_up(in_size, LANE)
    h1_p = _round_up(h1_size, LANE)
    h2_p = _round_up(h2_size, LANE)
    out_p = _round_up(out_size, LANE)

    def pad2(a, rows, cols):
        return jnp.pad(a, ((0, rows - a.shape[0]), (0, cols - a.shape[1])))

    # Batch tiling: pipeline (tm, in_p) x-tiles; pin weights across the grid.
    tm = min(block_m, _round_up(batch, 8))
    padded_batch = _round_up(batch, tm)
    grid = (padded_batch // tm,)

    x_p = pad2(x, padded_batch, in_p).astype(jnp.bfloat16)
    w1_p = pad2(w1, in_p, h1_p).astype(jnp.bfloat16)
    w2_p = pad2(w2, h1_p, h2_p).astype(jnp.bfloat16)
    w3_p = pad2(w3, h2_p, out_p).astype(jnp.bfloat16)
    b1_p = jnp.pad(b1, (0, h1_p - h1_size)).reshape(1, -1).astype(jnp.float32)
    b2_p = jnp.pad(b2, (0, h2_p - h2_size)).reshape(1, -1).astype(jnp.float32)
    b3_p = jnp.pad(b3, (0, out_p - out_size)).reshape(1, -1).astype(jnp.float32)

    pinned = lambda shape: pl.BlockSpec(shape, lambda i: (0, 0))

    out_padded = pl.pallas_call(
        mlp_kernel,
        out_shape=jax.ShapeDtypeStruct((padded_batch, out_p), jnp.float32),
        grid=grid,
        in_specs=[
            pl.BlockSpec((tm, in_p), lambda i: (i, 0)),   # x tile per grid step
            pinned(w1_p.shape), pinned(b1_p.shape),        # weights/biases pinned
            pinned(w2_p.shape), pinned(b2_p.shape),
            pinned(w3_p.shape), pinned(b3_p.shape),
        ],
        out_specs=pl.BlockSpec((tm, out_p), lambda i: (i, 0)),
        compiler_params=pltpu.CompilerParams(
            dimension_semantics=("parallel",)),            # v7x: shard over 2 TCs
    )(x_p, w1_p, b1_p, w2_p, b2_p, w3_p, b3_p)

    return out_padded[:batch, :out_size]


def reference_forward(x, w1, b1, w2, b2, w3, b3):
    h1 = jnp.maximum(x @ w1 + b1, 0.0)
    h2 = jnp.maximum(h1 @ w2 + b2, 0.0)
    return jax.nn.sigmoid(h2 @ w3 + b3)


if __name__ == "__main__":
    # Small, forward-consistent shapes (the real win at production scale is
    # feeding a much larger batch through the same call; the grid handles it).
    batch = 8
    input_size, hidden_size1, hidden_size2, output_size = 32, 64, 32, 16

    key = jax.random.PRNGKey(0)
    kx, k1, k2, k3, kb1, kb2, kb3 = jax.random.split(key, 7)

    x = jax.random.normal(kx, (batch, input_size), dtype=jnp.float32)

    # Deterministic init, roughly PyTorch's fan-in uniform. Stored [in, out].
    def init_linear(kw, kb, fan_in, fan_out):
        bound = 1.0 / (fan_in ** 0.5)
        w = jax.random.uniform(kw, (fan_in, fan_out), jnp.float32, -bound, bound)
        b = jax.random.uniform(kb, (fan_out,), jnp.float32, -bound, bound)
        return w, b

    w1, b1 = init_linear(k1, kb1, input_size, hidden_size1)
    w2, b2 = init_linear(k2, kb2, hidden_size1, hidden_size2)
    w3, b3 = init_linear(k3, kb3, hidden_size2, output_size)

    out = simple_neural_network(x, w1, b1, w2, b2, w3, b3)
    out = jax.block_until_ready(out)

    ref = reference_forward(x, w1, b1, w2, b2, w3, b3)
    assert out.shape == (batch, output_size)
    # bf16 matmul operands (f32 accumulation) -> loosened tolerance vs f32 ref.
    assert jnp.allclose(out, ref, atol=2e-2, rtol=2e-2), float(
        jnp.max(jnp.abs(out - ref)))

    print("KERNEL_OK")
</pallas_src>

<mosaic_0001>
module attributes {stable_mosaic.version = 11 : i64} {
  func.func @mlp_kernel(%arg0: i32, %arg1: memref<8x128xbf16, #tpu.memory_space<vmem>>, %arg2: memref<128x128xbf16, #tpu.memory_space<vmem>>, %arg3: memref<1x128xf32, #tpu.memory_space<vmem>>, %arg4: memref<128x128xbf16, #tpu.memory_space<vmem>>, %arg5: memref<1x128xf32, #tpu.memory_space<vmem>>, %arg6: memref<128x128xbf16, #tpu.memory_space<vmem>>, %arg7: memref<1x128xf32, #tpu.memory_space<vmem>>, %arg8: memref<8x128xf32, #tpu.memory_space<vmem>>) attributes {dimension_semantics = [#tpu.dimension_semantics<parallel>], iteration_bounds = array<i64: 1>, scalar_prefetch = 0 : i64, scratch_operands = 0 : i64, tpu.core_type = #tpu.core_type<tc>, window_params = [{transform_indices = @transform_0, window_bounds = array<i64: 8, 128>}, {pipeline_mode = #tpu.pipeline_mode<synchronous>, transform_indices = @transform_1, window_bounds = array<i64: 128, 128>}, {pipeline_mode = #tpu.pipeline_mode<synchronous>, transform_indices = @transform_2, window_bounds = array<i64: 1, 128>}, {pipeline_mode = #tpu.pipeline_mode<synchronous>, transform_indices = @transform_3, window_bounds = array<i64: 128, 128>}, {pipeline_mode = #tpu.pipeline_mode<synchronous>, transform_indices = @transform_4, window_bounds = array<i64: 1, 128>}, {pipeline_mode = #tpu.pipeline_mode<synchronous>, transform_indices = @transform_5, window_bounds = array<i64: 128, 128>}, {pipeline_mode = #tpu.pipeline_mode<synchronous>, transform_indices = @transform_6, window_bounds = array<i64: 1, 128>}, {transform_indices = @transform_7, window_bounds = array<i64: 8, 128>}]} {
    %c0 = arith.constant 0 : index
    %c0_0 = arith.constant 0 : index
    %0 = vector.load %arg1[%c0, %c0_0] : memref<8x128xbf16, #tpu.memory_space<vmem>>, vector<8x128xbf16>
    %c0_1 = arith.constant 0 : index
    %c0_2 = arith.constant 0 : index
    %1 = vector.load %arg2[%c0_1, %c0_2] : memref<128x128xbf16, #tpu.memory_space<vmem>>, vector<128x128xbf16>
    %cst = arith.constant dense<0.000000e+00> : vector<8x128xf32>
    %2 = tpu.matmul %0, %1, %cst {dimension_numbers = #tpu.dot_dimension_numbers<[1], [0], [0], [1], [0, 0, 1, 1], [], []>} : vector<8x128xbf16>, vector<128x128xbf16>, vector<8x128xf32> -> vector<8x128xf32>
    %c0_3 = arith.constant 0 : index
    %c0_4 = arith.constant 0 : index
    %3 = vector.load %arg3[%c0_3, %c0_4] : memref<1x128xf32, #tpu.memory_space<vmem>>, vector<1x128xf32>
    %4 = vector.broadcast %3 : vector<1x128xf32> to vector<8x128xf32>
    %5 = arith.addf %2, %4 : vector<8x128xf32>
    %cst_5 = arith.constant 0.000000e+00 : f32
    %6 = vector.broadcast %cst_5 : f32 to vector<8x128xf32>
    %7 = arith.maximumf %5, %6 : vector<8x128xf32>
    %8 = arith.truncf %7 : vector<8x128xf32> to vector<8x128xbf16>
    %c0_6 = arith.constant 0 : index
    %c0_7 = arith.constant 0 : index
    %9 = vector.load %arg4[%c0_6, %c0_7] : memref<128x128xbf16, #tpu.memory_space<vmem>>, vector<128x128xbf16>
    %cst_8 = arith.constant dense<0.000000e+00> : vector<8x128xf32>
    %10 = tpu.matmul %8, %9, %cst_8 {dimension_numbers = #tpu.dot_dimension_numbers<[1], [0], [0], [1], [0, 0, 1, 1], [], []>} : vector<8x128xbf16>, vector<128x128xbf16>, vector<8x128xf32> -> vector<8x128xf32>
    %c0_9 = arith.constant 0 : index
    %c0_10 = arith.constant 0 : index
    %11 = vector.load %arg5[%c0_9, %c0_10] : memref<1x128xf32, #tpu.memory_space<vmem>>, vector<1x128xf32>
    %12 = vector.broadcast %11 : vector<1x128xf32> to vector<8x128xf32>
    %13 = arith.addf %10, %12 : vector<8x128xf32>
    %cst_11 = arith.constant 0.000000e+00 : f32
    %14 = vector.broadcast %cst_11 : f32 to vector<8x128xf32>
    %15 = arith.maximumf %13, %14 : vector<8x128xf32>
    %16 = arith.truncf %15 : vector<8x128xf32> to vector<8x128xbf16>
    %c0_12 = arith.constant 0 : index
    %c0_13 = arith.constant 0 : index
    %17 = vector.load %arg6[%c0_12, %c0_13] : memref<128x128xbf16, #tpu.memory_space<vmem>>, vector<128x128xbf16>
    %cst_14 = arith.constant dense<0.000000e+00> : vector<8x128xf32>
    %18 = tpu.matmul %16, %17, %cst_14 {dimension_numbers = #tpu.dot_dimension_numbers<[1], [0], [0], [1], [0, 0, 1, 1], [], []>} : vector<8x128xbf16>, vector<128x128xbf16>, vector<8x128xf32> -> vector<8x128xf32>
    %c0_15 = arith.constant 0 : index
    %c0_16 = arith.constant 0 : index
    %19 = vector.load %arg7[%c0_15, %c0_16] : memref<1x128xf32, #tpu.memory_space<vmem>>, vector<1x128xf32>
    %20 = vector.broadcast %19 : vector<1x128xf32> to vector<8x128xf32>
    %21 = arith.addf %18, %20 : vector<8x128xf32>
    %cst_17 = arith.constant 0.000000e+00 : f32
    %22 = vector.broadcast %cst_17 : f32 to vector<8x128xf32>
    %23 = arith.subf %22, %21 : vector<8x128xf32>
    %24 = math.exp %23 : vector<8x128xf32>
    %cst_18 = arith.constant 1.000000e+00 : f32
    %25 = vector.broadcast %cst_18 : f32 to vector<8x128xf32>
    %26 = arith.addf %25, %24 : vector<8x128xf32>
    %27 = tpu.reciprocal %26 {approx = true} : vector<8x128xf32> -> vector<8x128xf32>
    %c0_19 = arith.constant 0 : index
    %c0_20 = arith.constant 0 : index
    %28 = vector.load %arg8[%c0_19, %c0_20] : memref<8x128xf32, #tpu.memory_space<vmem>>, vector<8x128xf32>
    tpu.vector_store %arg8[%c0_19, %c0_20], %27 {strides = array<i32>} : memref<8x128xf32, #tpu.memory_space<vmem>>, vector<8x128xf32>,
    return
  }
  func.func @transform_0(%arg0: i32) -> (i32, i32) {
    %c0_i32 = arith.constant 0 : i32
    %c0_i32_0 = arith.constant 0 : i32
    return %arg0, %c0_i32 : i32, i32
  }
  func.func @transform_1(%arg0: i32) -> (i32, i32) {
    %c0_i32 = arith.constant 0 : i32
    %c0_i32_0 = arith.constant 0 : i32
    %c0_i32_1 = arith.constant 0 : i32
    return %c0_i32, %c0_i32_0 : i32, i32
  }
  func.func @transform_2(%arg0: i32) -> (i32, i32) {
    %c0_i32 = arith.constant 0 : i32
    %c0_i32_0 = arith.constant 0 : i32
    %c0_i32_1 = arith.constant 0 : i32
    return %c0_i32, %c0_i32_0 : i32, i32
  }
  func.func @transform_3(%arg0: i32) -> (i32, i32) {
    %c0_i32 = arith.constant 0 : i32
    %c0_i32_0 = arith.constant 0 : i32
    %c0_i32_1 = arith.constant 0 : i32
    return %c0_i32, %c0_i32_0 : i32, i32
  }
  func.func @transform_4(%arg0: i32) -> (i32, i32) {
    %c0_i32 = arith.constant 0 : i32
    %c0_i32_0 = arith.constant 0 : i32
    %c0_i32_1 = arith.constant 0 : i32
    return %c0_i32, %c0_i32_0 : i32, i32
  }
  func.func @transform_5(%arg0: i32) -> (i32, i32) {
    %c0_i32 = arith.constant 0 : i32
    %c0_i32_0 = arith.constant 0 : i32
    %c0_i32_1 = arith.constant 0 : i32
    return %c0_i32, %c0_i32_0 : i32, i32
  }
  func.func @transform_6(%arg0: i32) -> (i32, i32) {
    %c0_i32 = arith.constant 0 : i32
    %c0_i32_0 = arith.constant 0 : i32
    %c0_i32_1 = arith.constant 0 : i32
    return %c0_i32, %c0_i32_0 : i32, i32
  }
  func.func @transform_7(%arg0: i32) -> (i32, i32) {
    %c0_i32 = arith.constant 0 : i32
    %c0_i32_0 = arith.constant 0 : i32
    return %arg0, %c0_i32 : i32, i32
  }
}

</mosaic_0001>

<bundles_post_ra>
// kernel: tpu_custom_call.1
= control target key start
LH: loop header
LB: loop body
LE: loop exit
PB: predicated region body
PF: predicated region fallthrough
CT: control target
= control target key end

     0   :  { %12 = vsyncpa [#allocation3], 0  ;;  %s694_s0 = inlined_call_operand.hbm [shape: bf16[8,128], index: 0, kind: input, shape index: {}]   ;;  %s695_s1 = inlined_call_operand.hbm [shape: bf16[128,128], index: 1, kind: input, shape index: {}]   ;;  %s696_s2 = inlined_call_operand.vmem [shape: f32[1,128], index: 2, kind: input, shape index: {}]   ;;  %s697_s3 = inlined_call_operand.hbm [shape: bf16[128,128], index: 3, kind: input, shape index: {}]   ;;  %s698_s4 = inlined_call_operand.vmem [shape: f32[1,128], index: 4, kind: input, shape index: {}]   ;;  %s699_s5 = inlined_call_operand.hbm [shape: bf16[128,128], index: 5, kind: input, shape index: {}]   ;;  %s700_s6 = inlined_call_operand.vmem [shape: f32[1,128], index: 6, kind: input, shape index: {}]   ;;  %s701_s7 = inlined_call_operand.hbm [shape: f32[8,128], index: 7, kind: output, shape index: {}]  }
   0x1   :  { %13 = vsyncpa [#allocation6], 0 }
   0x2   :  { %14 = vsyncpa [#allocation9], 0  ;;  %s31_s26 = sshll.u32 %s695_s1, 4  ;;  %s32_s26 = int_to_ptr.hbm [resolvable:$true] %s31_s26 }
   0x3   :  { %15 = vsyncpa [#allocation4], 0  ;;  %s623_s27 = smov [#allocation5]   ;;  %s21_s8 = sshll.u32 %s694_s0, 4  ;;  %s22_s8 = int_to_ptr.hbm [resolvable:$true] %s21_s8 }
   0x4   :  { %s33_s28 = sshll.u32 %s623_s27, 4  ;;  %s624_s9 = smov 64   ;;  %s34_s28 = int_to_ptr.vmem [resolvable:$true] %s33_s28 }
   0x5   :  { %s625_s10 = smov 4   ;;  %s626_s11 = smov [#allocation2]  }
   0x6   :  { %39 = dma.hbm_to_vmem [thread:$0]  %s32_s26, 1024, %s34_s28, [#allocation6], %s624_s9, %s624_s9, %s625_s10  }
   0x7   :  { %s23_s12 = sshll.u32 %s626_s11, 4  ;;  %s46_s15 = sshll.u32 %s697_s3, 4  ;;  %s24_s12 = int_to_ptr.vmem [resolvable:$true] %s23_s12  ;;  %s47_s15 = int_to_ptr.hbm [resolvable:$true] %s46_s15 }
   0x8   :  { %26 = dma.hbm_to_vmem [thread:$0]  %s22_s8, 64, %s24_s12, [#allocation3]  }
   0x9   :  { %s61_s17 = sshll.u32 %s699_s5, 4  ;;  %s627_s18 = smov [#allocation7]   ;;  %s62_s17 = int_to_ptr.hbm [resolvable:$true] %s61_s17 }
   0xa   :  { %s48_s19 = sshll.u32 %s627_s18, 4  ;;  %s628_s0 = smov [#allocation8]   ;;  %s49_s19 = int_to_ptr.vmem [resolvable:$true] %s48_s19 }
   0xb   :  { %54 = dma.hbm_to_vmem [thread:$0]  %s47_s15, 1024, %s49_s19, [#allocation6], %s624_s9, %s624_s9, %s625_s10  }
   0xc   :  { %s63_s20 = sshll.u32 %s628_s0, 4  ;;  %s64_s20 = int_to_ptr.vmem [resolvable:$true] %s63_s20 }
   0xd   :  { %69 = dma.hbm_to_vmem [thread:$0]  %s62_s17, 1024, %s64_s20, [#allocation9], %s624_s9, %s624_s9, %s625_s10  }
   0xe   :  { %615 = dma.done.wait [#allocation3], 64  }
   0xf   :  { %616 = vsyncadd [#allocation3], 4294967232 }
  0x10   :  { %617 = dma.done.wait [#allocation6], 2048  }
  0x11   :  { %618 = vsyncadd [#allocation6], 4294965248 }
  0x12   :  { %619 = dma.done.wait [#allocation9], 1024  }
  0x13   :  { %620 = vsyncadd [#allocation9], 4294966272  ;;  %v464_v0 = vld [vmem:[#allocation5 + $0x38] sm:$0xff]  ;;  %v463_v1 = vld [vmem:[#allocation5 + $0x30] sm:$0xff]  ;;  %s349_s27 = sshll.u32 %s701_s7, 4  ;;  %s350_s27 = int_to_ptr.hbm [resolvable:$true] %s349_s27 }
  0x14   :  { %157 = vmatpush.bf16.msra.mxu0 %v464_v0  ;;  %v472_v2 = vld [vmem:[#allocation7 + $0x38] sm:$0xff]  ;;  %v471_v3 = vld [vmem:[#allocation7 + $0x30] sm:$0xff]  ;;  %v462_v4 = vld [vmem:[#allocation5 + $0x28] sm:$0xff] }
  0x15   :  { %240 = vmatpush.bf16.msra.mxu1 %v472_v2  ;;  %v470_v5 = vld [vmem:[#allocation7 + $0x28] sm:$0xff]  ;;  %v461_v6 = vld [vmem:[#allocation5 + $0x20] sm:$0xff]  ;;  %v460_v8 = vld [vmem:[#allocation5 + $0x18] sm:$0xff] }
  0x16   :  { %v469_v7 = vld [vmem:[#allocation7 + $0x20] sm:$0xff]  ;;  %v468_v9 = vld [vmem:[#allocation7 + $0x18] sm:$0xff]  ;;  %v459_v10 = vld [vmem:[#allocation5 + $0x10] sm:$0xff] }
  0x17   :  { %v467_v11 = vld [vmem:[#allocation7 + $0x10] sm:$0xff]  ;;  %v458_v12 = vld [vmem:[#allocation5 + $0x8] sm:$0xff]  ;;  %v457_v13 = vld [vmem:[#allocation5] sm:$0xff] }
  0x18   :  { %158 = vmatpush.bf16.msra.mxu0 %v463_v1  ;;  %v88_v14 = vld [vmem:[#allocation2] sm:$0xf]  ;;  %v466_v15 = vld [vmem:[#allocation7 + $0x8] sm:$0xff]  ;;  %v465_v16 = vld [vmem:[#allocation7] sm:$0xff] }
  0x19   :  { %241 = vmatpush.bf16.msra.mxu1 %v471_v3  ;;  %v480_v17 = vld [vmem:[#allocation8 + $0x38] sm:$0xff]  ;;  %v479_v18 = vld [vmem:[#allocation8 + $0x30] sm:$0xff]  ;;  %v478_v19 = vld [vmem:[#allocation8 + $0x28] sm:$0xff] }
  0x1a   :  { %323 = vmatpush.bf16.msra.mxu2 %v480_v17  ;;  %v477_v20 = vld [vmem:[#allocation8 + $0x20] sm:$0xff]  ;;  %v476_v21 = vld [vmem:[#allocation8 + $0x18] sm:$0xff]  ;;  %v475_v22 = vld [vmem:[#allocation8 + $0x10] sm:$0xff] }
  0x1b   :  { %v488_v23 = vld [vmem:[%s696_s2] ss:$0 sm:$0xff]  ;;  %v474_v29 = vld [vmem:[#allocation8 + $0x8] sm:$0xff]  ;;  %v473_v30 = vld [vmem:[#allocation8] sm:$0xff] }
  0x1c   :  { %159 = vmatpush.bf16.msra.mxu0 %v462_v4  ;;  %v489_v31 = vld [vmem:[%s698_s4] ss:$0 sm:$0xff]  ;;  %s629_s4 = smov [#allocation10]  }
  0x1d   :  { %242 = vmatpush.bf16.msra.mxu1 %v470_v5  ;;  %v490_v37 = vld [vmem:[%s700_s6] ss:$0 sm:$0xff]  ;;  %s347_s24 = sshll.u32 %s629_s4, 4  ;;  %s348_s24 = int_to_ptr.vmem [resolvable:$true] %s347_s24 }
  0x1e   :  { %324 = vmatpush.bf16.msra.mxu2 %v479_v18 }
  0x20   :  { %160 = vmatpush.bf16.msra.mxu0 %v461_v6 }
  0x21   :  { %243 = vmatpush.bf16.msra.mxu1 %v469_v7 }
  0x22   :  { %325 = vmatpush.bf16.msra.mxu2 %v478_v19 }
  0x24   :  { %161 = vmatpush.bf16.msra.mxu0 %v460_v8 }
  0x25   :  { %244 = vmatpush.bf16.msra.mxu1 %v468_v9 }
  0x26   :  { %326 = vmatpush.bf16.msra.mxu2 %v477_v20 }
  0x28   :  { %162 = vmatpush.bf16.msra.mxu0 %v459_v10 }
  0x29   :  { %245 = vmatpush.bf16.msra.mxu1 %v467_v11 }
  0x2a   :  { %327 = vmatpush.bf16.msra.mxu2 %v476_v21 }
  0x2c   :  { %163 = vmatpush.bf16.msra.mxu0 %v458_v12 }
  0x2d   :  { %246 = vmatpush.bf16.msra.mxu1 %v466_v15 }
  0x2e   :  { %328 = vmatpush.bf16.msra.mxu2 %v475_v22 }
  0x30   :  { %164 = vmatpush.bf16.msra.mxu0 %v457_v13 }
  0x31   :  { %247 = vmatpush.bf16.msra.mxu1 %v465_v16 }
  0x32   :  { %329 = vmatpush.bf16.msra.mxu2 %v474_v29 }
  0x33   :  { %165 = vmatmul.bf16.vlgmr.msra.gmra.mxu0 %v88_v14 }
  0x36   :  { %330 = vmatpush.bf16.msra.mxu2 %v473_v30 }
  0xb0   :  { %v166_v24 = vpop.f32.mrf.mxu0 }
  0xb1   :  { %v167_v25 = vadd.f32 %v488_v23, %v166_v24 }
  0xb3   :  { %v170_v26 = vmax.f32 %v167_v25, 0.0 }
  0xb5   :  { %v171_v27 = vpack.c.bf16 %v170_v26, %v170_v26 }
  0xb7   :  { %248 = vmatmul.bf16.vlgmr.msra.gmra.mxu1 %v171_v27 }
  0xb8   :  { %v168_v28 = vpop.f32.mrf.mxu0 }
 0x134   :  { %v249_v32 = vpop.f32.mrf.mxu1 }
 0x135   :  { %v250_v33 = vadd.f32 %v489_v31, %v249_v32 }
 0x137   :  { %v253_v34 = vmax.f32 %v250_v33, 0.0 }
 0x139   :  { %v254_v35 = vpack.c.bf16 %v253_v34, %v253_v34 }
 0x13b   :  { %331 = vmatmul.bf16.vlgmr.msra.gmra.mxu2 %v254_v35 }
 0x13c   :  { %v251_v36 = vpop.f32.mrf.mxu1 }
 0x1be   :  { %v332_v38 = vpop.f32.mrf.mxu2 }
 0x1bf   :  { %v333_v39 = vadd.f32 %v490_v37, %v332_v38 }
 0x1c1   :  { %v336_v40 = vsub.f32 0.0, %v333_v39 }
 0x1c3   :  { %v337_v41 = vmul.f32 1.442695, %v336_v40 }
 0x1c5   :  { %491 = vpow2.f32 %v337_v41 }
 0x1c6   :  { %v334_v42 = vpop.f32.mrf.mxu2 }
 0x1cb   :  { %v492_v43 = vpop.eup %491 }
 0x1cc   :  { %v339_v44 = vadd.f32 1.0, %v492_v43 }
 0x1ce   :  { %493 = vrcp.f32 %v339_v44 }
 0x1d4   :  { %v494_v45 = vpop.eup %493 }
 0x1d5   :  { %341 = vst [vmem:[#allocation10] sm:$0xff] %v494_v45 }
 0x1d6   :  { %352 = dma.vmem_to_hbm [thread:$0]  %s348_s24, 128, %s350_s27, [#allocation4]  }
 0x1d7   :  { %621 = dma.done.wait [#allocation4], 128  }
 0x1d8   :  { %622 = vsyncadd [#allocation4], 4294967168 }
 0x1d9   :  { %357 = vsyncpa [#allocation3], 1 }
 0x1da   :  { %358 = vsyncpa [#allocation6], 1 }
 0x1db   :  { %359 = vsyncpa [#allocation9], 1 }
 0x1dc   :  { %360 = vsyncpa [#allocation4], 1 }

</bundles_post_ra>
